<compile_context>
chip_gen: v5e
topology: v5e:2x2
jax: 0.10.0
libtpu: 0.0.40
codegen_flags: <defaults>
</compile_context>

<pallas_src>
import math

import jax
import jax.numpy as jnp
from jax import lax
from jax.experimental import pallas as pl
from jax.experimental.pallas import tpu as pltpu


def _round_up(x, m):
    return ((x + m - 1) // m) * m


def _vmem_capacity_bytes():
    """Physical VMEM per TensorCore; conservative 64 MiB (v7x) if it can't be queried."""
    try:
        info = pltpu.get_tpu_info()
        cap = int(getattr(info, "vmem_capacity_bytes", 0) or 0)
        if cap > 0:
            return cap
    except Exception:
        pass
    return 64 * 1024 * 1024


def recommended_stream_dtype():
    """bf16 weight/activation streaming (f32 accumulate) is the right default on v5e
    (slowest HBM, bf16-only MXU fast path); keep f32 when exact parity matters."""
    try:
        kind = jax.devices()[0].device_kind.lower()
        if "v5 lite" in kind or "v5e" in kind:
            return jnp.bfloat16
    except Exception:
        pass
    return jnp.float32


def prepare_linear_params(weight, bias, *, stream_dtype=jnp.float32):
    """One-time parameter prep (do at init, NOT per forward).

    weight : [out_dim, K]  native PyTorch nn.Linear layout
    bias   : [out_dim]
    Returns:
      w_t   : [K, padded_N]  transposed weight, N zero-padded to a multiple of 128
      b_row : [1, padded_N]  f32 bias row, zero-padded

    Lane-dense N is the biggest single lever: a 10-wide output would otherwise use
    10/128 lanes of every MXU result column and force masked partial stores.
    """
    out_dim, K = weight.shape
    padded_N = _round_up(out_dim, 128)
    w_t = jnp.asarray(weight).T.astype(stream_dtype)          # [K, out_dim]
    if padded_N != out_dim:
        w_t = jnp.pad(w_t, ((0, 0), (0, padded_N - out_dim)))
    b_row = jnp.pad(jnp.asarray(bias, jnp.float32), (0, padded_N - out_dim))
    return w_t, b_row.reshape(1, padded_N)


def _make_linear_kernel(K, tk, n_k, ragged):
    """Kernel body with static K / tk / n_k / ragged baked in."""

    def kernel(x_ref, w_ref, b_ref, o_ref):
        # x_ref : [tm, tk]   current K-slab of the flattened input
        # w_ref : [tk, tn]   current K-slab of the pre-transposed, lane-padded weight
        # b_ref : [1, tn]    bias tile (same N tile every K step)
        # o_ref : [tm, tn]   f32 output, resident across the K axis
        k = pl.program_id(2)

        @pl.when(k == 0)
        def _():
            # Initialize the resident accumulator with the bias (added exactly once).
            o_ref[...] = jnp.broadcast_to(b_ref[...], o_ref.shape).astype(jnp.float32)

        if not ragged:
            # Hot path: bare MXU contraction, no masking at all.
            o_ref[...] += jnp.dot(x_ref[...], w_ref[...],
                                  preferred_element_type=jnp.float32)
        else:
            @pl.when(k < n_k - 1)
            def _():
                # All-but-last K steps: no mask on the hot path.
                o_ref[...] += jnp.dot(x_ref[...], w_ref[...],
                                      preferred_element_type=jnp.float32)

            @pl.when(k == n_k - 1)
            def _():
                # Last (ragged) K step only: zero BOTH operands past K so undefined
                # out-of-bounds bytes (possibly NaN) cannot poison the accumulation.
                rem = K - (n_k - 1) * tk        # static Python int
                x = x_ref[...]
                w = w_ref[...]
                col = lax.broadcasted_iota(jnp.int32, x.shape, 1)   # K is lane axis of x
                x = jnp.where(col < rem, x, jnp.zeros_like(x))
                row = lax.broadcasted_iota(jnp.int32, w.shape, 0)   # K is sublane axis of w
                w = jnp.where(row < rem, w, jnp.zeros_like(w))
                o_ref[...] += jnp.dot(x, w, preferred_element_type=jnp.float32)

    return kernel


def wide_resnet_forward(x, w_t, b_row, out_dim, *, tk_cap=4096, force_kernel=False):
    """Pallas implementation of WideResNet.forward.

    x      : [B, ...]            flattened per-sample to K = prod(x.shape[1:])
    w_t    : [K, padded_N]       from prepare_linear_params
    b_row  : [1, padded_N]       from prepare_linear_params
    out_dim: true output width (<= padded_N)
    returns: [B, out_dim] in x.dtype
    """
    B = x.shape[0]
    K = int(math.prod(x.shape[1:]))
    Kw, padded_N = w_t.shape
    assert Kw == K, f"prepared weight K={Kw} inconsistent with input K={K}"
    assert b_row.shape == (1, padded_N)
    assert out_dim <= padded_N

    x_flat = x.reshape(B, K)
    if w_t.dtype != x_flat.dtype:
        x_flat = x_flat.astype(w_t.dtype)           # e.g. bf16 streaming path
    itemsize = jnp.dtype(w_t.dtype).itemsize

    # ---- Tiny-problem fast path: the pallas_call is pure launch/pipeline overhead
    # at these sizes; XLA's fused dot matches or beats it on every generation. ----
    total_bytes = 4 * (B * K + K * padded_N + B * padded_N)
    if (not force_kernel) and total_bytes <= (2 << 20):
        y = jnp.dot(x_flat, w_t, preferred_element_type=jnp.float32) + b_row
        return y[:, :out_dim].astype(x.dtype)

    # ---- Chip-aware VMEM budgets. ----
    cap = _vmem_capacity_bytes()
    if cap <= 64 * 1024 * 1024:
        # v7x-class: 64 MiB physical per TensorCore -> leave headroom for compiler scratch.
        stream_budget = 22 * 1024 * 1024
        vmem_ceiling = 52 * 1024 * 1024
    else:
        # v5e / v6e: 128 MiB physical -> bigger K slabs, fewer grid steps, bigger DMAs.
        stream_budget = 56 * 1024 * 1024
        vmem_ceiling = 100 * 1024 * 1024

    # ---- M (batch) tiling: pad B to a multiple of 8, cap the tile at 256 rows. ----
    tm = min(256, _round_up(B, 8))
    B_pad = _round_up(B, tm)
    if B_pad != B:
        x_flat = jnp.pad(x_flat, ((0, B_pad - B), (0, 0)))
    n_m = B_pad // tm

    # ---- N (out_dim) tiling: lane-dense tiles; padded_N is a multiple of 128. ----
    tn = 512 if padded_N % 512 == 0 else (256 if padded_N % 256 == 0 else 128)
    if n_m == 1 and padded_N // tn < 2 and padded_N >= 256:
        # Give the second TensorCore (v7x megacore) something to do when B is small.
        tn = padded_N // 2 if (padded_N // 2) % 128 == 0 else 128
    n_n = padded_N // tn

    # ---- K tiling: single step for small K, else largest 128-multiple in budget. ----
    per_k_col = 2 * (tm + tn) * itemsize            # double-buffered x + W bytes per K column
    budget_tk = max(128, stream_budget // per_k_col)
    if K <= min(tk_cap, budget_tk):
        tk = K                                      # single K step; block == full K dim
    else:
        tk = min(tk_cap, budget_tk)
        tk = max(128, (tk // 128) * 128)            # keep (8,128) legality
    n_k = pl.cdiv(K, tk)
    ragged = (K % tk) != 0

    working_set = (2 * (tm + tn) * tk * itemsize    # double-buffered x + W slabs
                   + 2 * tm * tn * 4                # double-buffered f32 output block
                   + 2 * padded_N * 4)              # bias
    vmem_limit = int(min(vmem_ceiling,
                         max(32 * 1024 * 1024, int(1.25 * working_set) + (2 << 20))))

    cost = pl.CostEstimate(
        flops=2 * B_pad * K * padded_N,
        transcendentals=0,
        # x is re-streamed n_n times, W is re-streamed n_m times.
        bytes_accessed=(n_n * B_pad * K + n_m * padded_N * K) * itemsize
                       + 4 * (B_pad * padded_N + padded_N),
    )

    # v7x only: if the 64 MiB VMEM forces small per-step weight DMAs over a long K
    # loop, a third pipeline stage hides the exposed DMA latency.
    w_spec_kwargs = {}
    if cap <= 64 * 1024 * 1024 and n_k >= 8 and tk <= 1024:
        w_spec_kwargs["pipeline_mode"] = pl.Buffered(3)

    out_f32 = pl.pallas_call(
        _make_linear_kernel(K, tk, n_k, ragged),
        out_shape=jax.ShapeDtypeStruct((B_pad, padded_N), jnp.float32),
        grid_spec=pltpu.PrefetchScalarGridSpec(
            num_scalar_prefetch=0,
            grid=(n_m, n_n, n_k),
            in_specs=[
                pl.BlockSpec((tm, tk), lambda m, n, k: (m, k)),                    # x slab
                pl.BlockSpec((tk, tn), lambda m, n, k: (k, n), **w_spec_kwargs),   # W slab
                pl.BlockSpec((1, tn), lambda m, n, k: (0, n)),                     # bias tile
            ],
            out_specs=pl.BlockSpec((tm, tn), lambda m, n, k: (m, n)),
        ),
        compiler_params=pltpu.CompilerParams(
            dimension_semantics=("parallel", "parallel", "arbitrary"),
            vmem_limit_bytes=vmem_limit,
        ),
        cost_estimate=cost,
    )(x_flat, w_t, b_row)

    return out_f32[:B, :out_dim].astype(x.dtype)


def init_params(input_shape, output_dim, key):
    """Deterministic nn.Linear-style init (uniform +/- 1/sqrt(fan_in)), native layout."""
    fc_size = int(math.prod(input_shape))
    bound = 1.0 / math.sqrt(fc_size)
    kw, kb = jax.random.split(key)
    weight = jax.random.uniform(
        kw, (output_dim, fc_size), jnp.float32, minval=-bound, maxval=bound
    )
    bias = jax.random.uniform(
        kb, (output_dim,), jnp.float32, minval=-bound, maxval=bound
    )
    return weight, bias


if __name__ == "__main__":
    # Small shapes consistent with the module: input_shape=(4,16,16), output_dim=10
    B = 2
    input_shape = (4, 16, 16)
    output_dim = 10

    key = jax.random.PRNGKey(0)
    kx, kp = jax.random.split(key)
    x = jax.random.normal(kx, (B,) + input_shape, dtype=jnp.float32)
    weight, bias = init_params(input_shape, output_dim, kp)

    # One-time parameter prep (transpose + lane pad) — not per-forward work.
    # TODO(synk): pass stream_dtype=recommended_stream_dtype() on v5e for bf16 streaming
    # (halves weight HBM bytes, f32 accumulate) at the cost of exact f32 parity.
    w_t, b_row = prepare_linear_params(weight, bias, stream_dtype=jnp.float32)

    # Pure-JAX reference of the forward semantics.
    y_ref = x.reshape(B, -1) @ weight.T + bias

    # 1) Default dispatch: this problem is tiny -> plain XLA dot fast path.
    y_small = jax.block_until_ready(wide_resnet_forward(x, w_t, b_row, output_dim))
    assert y_small.shape == (B, output_dim)
    assert jnp.allclose(y_small, y_ref, atol=1e-4, rtol=1e-4)

    # 2) Force the Pallas kernel: single K step, lane-dense padded-N output.
    y_kernel = jax.block_until_ready(
        wide_resnet_forward(x, w_t, b_row, output_dim, force_kernel=True)
    )
    assert y_kernel.shape == (B, output_dim)
    assert jnp.allclose(y_kernel, y_ref, atol=1e-4, rtol=1e-4)

    # 3) Force the tiled path: multiple K steps with a ragged, masked-last-step tile.
    y_tiled = jax.block_until_ready(
        wide_resnet_forward(x, w_t, b_row, output_dim, force_kernel=True, tk_cap=384)
    )
    assert jnp.allclose(y_tiled, y_ref, atol=1e-4, rtol=1e-4)

    print("KERNEL_OK")
</pallas_src>

<mosaic_0001>
module attributes {stable_mosaic.version = 11 : i64} {
  func.func @kernel(%arg0: i32, %arg1: i32, %arg2: i32, %arg3: memref<8x1024xf32, #tpu.memory_space<vmem>>, %arg4: memref<1024x128xf32, #tpu.memory_space<vmem>>, %arg5: memref<1x128xf32, #tpu.memory_space<vmem>>, %arg6: memref<8x128xf32, #tpu.memory_space<vmem>>) attributes {dimension_semantics = [#tpu.dimension_semantics<parallel>, #tpu.dimension_semantics<parallel>, #tpu.dimension_semantics<arbitrary>], iteration_bounds = array<i64: 1, 1, 1>, scalar_prefetch = 0 : i64, scratch_operands = 0 : i64, tpu.core_type = #tpu.core_type<tc>, window_params = [{transform_indices = @transform_0, window_bounds = array<i64: 8, 1024>}, {transform_indices = @transform_1, window_bounds = array<i64: 1024, 128>}, {transform_indices = @transform_2, window_bounds = array<i64: 1, 128>}, {transform_indices = @transform_3, window_bounds = array<i64: 8, 128>}]} {
    %c0_i32 = arith.constant 0 : i32
    %0 = arith.cmpi eq, %arg2, %c0_i32 : i32
    %1 = arith.extui %0 : i1 to i32
    %c0_i32_0 = arith.constant 0 : i32
    %2 = arith.cmpi ne, %1, %c0_i32_0 : i32
    scf.if %2 {
      %c0_8 = arith.constant 0 : index
      %c0_9 = arith.constant 0 : index
      %9 = vector.load %arg5[%c0_8, %c0_9] : memref<1x128xf32, #tpu.memory_space<vmem>>, vector<1x128xf32>
      %10 = vector.shape_cast %9 : vector<1x128xf32> to vector<1x128xf32>
      %11 = vector.broadcast %10 : vector<1x128xf32> to vector<8x128xf32>
      %c0_10 = arith.constant 0 : index
      %c0_11 = arith.constant 0 : index
      %12 = vector.load %arg6[%c0_10, %c0_11] : memref<8x128xf32, #tpu.memory_space<vmem>>, vector<8x128xf32>
      tpu.vector_store %arg6[%c0_10, %c0_11], %11 {strides = array<i32>} : memref<8x128xf32, #tpu.memory_space<vmem>>, vector<8x128xf32>,
    } else {
    }
    %c0 = arith.constant 0 : index
    %c0_1 = arith.constant 0 : index
    %3 = vector.load %arg6[%c0, %c0_1] : memref<8x128xf32, #tpu.memory_space<vmem>>, vector<8x128xf32>
    %c0_2 = arith.constant 0 : index
    %c0_3 = arith.constant 0 : index
    %4 = vector.load %arg3[%c0_2, %c0_3] : memref<8x1024xf32, #tpu.memory_space<vmem>>, vector<8x1024xf32>
    %c0_4 = arith.constant 0 : index
    %c0_5 = arith.constant 0 : index
    %5 = vector.load %arg4[%c0_4, %c0_5] : memref<1024x128xf32, #tpu.memory_space<vmem>>, vector<1024x128xf32>
    %cst = arith.constant dense<0.000000e+00> : vector<8x128xf32>
    %6 = tpu.matmul %4, %5, %cst {dimension_numbers = #tpu.dot_dimension_numbers<[1], [0], [0], [1], [0, 0, 1, 1], [], []>} : vector<8x1024xf32>, vector<1024x128xf32>, vector<8x128xf32> -> vector<8x128xf32>
    %7 = arith.addf %3, %6 : vector<8x128xf32>
    %c0_6 = arith.constant 0 : index
    %c0_7 = arith.constant 0 : index
    %8 = vector.load %arg6[%c0_6, %c0_7] : memref<8x128xf32, #tpu.memory_space<vmem>>, vector<8x128xf32>
    tpu.vector_store %arg6[%c0_6, %c0_7], %7 {strides = array<i32>} : memref<8x128xf32, #tpu.memory_space<vmem>>, vector<8x128xf32>,
    return
  }
  func.func @transform_0(%arg0: i32, %arg1: i32, %arg2: i32) -> (i32, i32) {
    %c0_i32 = arith.constant 0 : i32
    return %arg0, %arg2 : i32, i32
  }
  func.func @transform_1(%arg0: i32, %arg1: i32, %arg2: i32) -> (i32, i32) {
    %c0_i32 = arith.constant 0 : i32
    return %arg2, %arg1 : i32, i32
  }
  func.func @transform_2(%arg0: i32, %arg1: i32, %arg2: i32) -> (i32, i32) {
    %c0_i32 = arith.constant 0 : i32
    %c0_i32_0 = arith.constant 0 : i32
    return %c0_i32, %arg1 : i32, i32
  }
  func.func @transform_3(%arg0: i32, %arg1: i32, %arg2: i32) -> (i32, i32) {
    %c0_i32 = arith.constant 0 : i32
    return %arg0, %arg1 : i32, i32
  }
}

</mosaic_0001>

<bundles_post_ra>
// kernel: tpu_custom_call.1
= control target key start
LH: loop header
LB: loop body
LE: loop exit
PB: predicated region body
PF: predicated region fallthrough
CT: control target
= control target key end

     0   :  { %8 = vsyncpa [#allocation3], 0  ;;  %s492_s0 = inlined_call_operand.hbm [shape: f32[8,1024], index: 0, kind: input, shape index: {}]   ;;  %s493_s1 = inlined_call_operand.hbm [shape: f32[1024,128], index: 1, kind: input, shape index: {}]   ;;  %s494_s2 = inlined_call_operand.vmem [shape: f32[1,128], index: 2, kind: input, shape index: {}]   ;;  %s495_s3 = inlined_call_operand.hbm [shape: f32[8,128], index: 3, kind: output, shape index: {}]  }
   0x1   :  { %9 = vsyncpa [#allocation6], 0 }
   0x2   :  { %10 = vsyncpa [#allocation4], 0  ;;  %s16_s14 = sshll.u32 %s492_s0, 4  ;;  %s455_s15 = smov [#allocation2]   ;;  %s17_s14 = int_to_ptr.hbm [resolvable:$true] %s16_s14 }
   0x3   :  { %s18_s16 = sshll.u32 %s455_s15, 4  ;;  %s26_s19 = sshll.u32 %s493_s1, 4  ;;  %s19_s16 = int_to_ptr.vmem [resolvable:$true] %s18_s16  ;;  %s27_s19 = int_to_ptr.hbm [resolvable:$true] %s26_s19 }
   0x4   :  { %21 = dma.hbm_to_vmem [thread:$0]  %s17_s14, 1024, %s19_s16, [#allocation3]  }
   0x5   :  { %s456_s20 = smov [#allocation5]   ;;  %s457_s22 = smov 128  }
   0x6   :  { %s28_s21 = sshll.u32 %s456_s20, 4  ;;  %s458_s23 = smov 8   ;;  %s29_s21 = int_to_ptr.vmem [resolvable:$true] %s28_s21 }
   0x7   :  { %34 = dma.hbm_to_vmem [thread:$0]  %s27_s19, 16384, %s29_s21, [#allocation6], %s457_s22, %s457_s22, %s458_s23  }
   0x8   :  { %449 = dma.done.wait [#allocation3], 1024  }
   0x9   :  { %450 = vsyncadd [#allocation3], 4294966272 }
   0xa   :  { %451 = dma.done.wait [#allocation6], 16384  }
   0xb   :  { %452 = vsyncadd [#allocation6], 4294950912  ;;  %v78_v0 = vld [vmem:[#allocation5 + $0x78] sm:$0xff]  ;;  %v77_v2 = vld [vmem:[#allocation5 + $0x70] sm:$0xff]  ;;  %s459_s24 = smov [#allocation7]   ;;  %s360_s28 = sshll.u32 %s495_s3, 4  ;;  %s361_s28 = int_to_ptr.hbm [resolvable:$true] %s360_s28 }
   0xc   :  { %v110_v1 = vld [vmem:[#allocation5 + $0x178] sm:$0xff]  ;;  %191 = vmatpush.msra.mxu0 %v78_v0  ;;  %v109_v4 = vld [vmem:[#allocation5 + $0x170] sm:$0xff]  ;;  %v76_v6 = vld [vmem:[#allocation5 + $0x68] sm:$0xff]  ;;  %s358_s25 = sshll.u32 %s459_s24, 4  ;;  %s359_s25 = int_to_ptr.vmem [resolvable:$true] %s358_s25 }
   0xd   :  { %231 = vmatpush.msra.mxu2 %v110_v1  ;;  %v94_v3 = vld [vmem:[#allocation5 + $0xf8] sm:$0xff]  ;;  %v93_v7 = vld [vmem:[#allocation5 + $0xf0] sm:$0xff]  ;;  %v108_v8 = vld [vmem:[#allocation5 + $0x168] sm:$0xff] }
   0xe   :  { %v126_v5 = vld [vmem:[#allocation5 + $0x1f8] sm:$0xff]  ;;  %211 = vmatpush.msra.mxu1 %v94_v3  ;;  %192 = vmatpush.msra.mxu0 %v77_v2  ;;  %v125_v9 = vld [vmem:[#allocation5 + $0x1f0] sm:$0xff]  ;;  %v92_v10 = vld [vmem:[#allocation5 + $0xe8] sm:$0xff] }
   0xf   :  { %251 = vmatpush.msra.mxu3 %v126_v5  ;;  %232 = vmatpush.msra.mxu2 %v109_v4  ;;  %v75_v11 = vld [vmem:[#allocation5 + $0x60] sm:$0xff]  ;;  %v124_v13 = vld [vmem:[#allocation5 + $0x1e8] sm:$0xff]  ;;  %v74_v16 = vld [vmem:[#allocation5 + $0x58] sm:$0xff] }
  0x10   :  { %212 = vmatpush.msra.mxu1 %v93_v7  ;;  %v107_v12 = vld [vmem:[#allocation5 + $0x160] sm:$0xff]  ;;  %193 = vmatpush.msra.mxu0 %v76_v6  ;;  %v106_v17 = vld [vmem:[#allocation5 + $0x158] sm:$0xff]  ;;  %v73_v20 = vld [vmem:[#allocation5 + $0x50] sm:$0xff] }
  0x11   :  { %252 = vmatpush.msra.mxu3 %v125_v9  ;;  %233 = vmatpush.msra.mxu2 %v108_v8  ;;  %v91_v14 = vld [vmem:[#allocation5 + $0xe0] sm:$0xff]  ;;  %v90_v18 = vld [vmem:[#allocation5 + $0xd8] sm:$0xff]  ;;  %v105_v21 = vld [vmem:[#allocation5 + $0x150] sm:$0xff] }
  0x12   :  { %v123_v15 = vld [vmem:[#allocation5 + $0x1e0] sm:$0xff]  ;;  %213 = vmatpush.msra.mxu1 %v92_v10  ;;  %194 = vmatpush.msra.mxu0 %v75_v11  ;;  %v122_v19 = vld [vmem:[#allocation5 + $0x1d8] sm:$0xff]  ;;  %v89_v22 = vld [vmem:[#allocation5 + $0xd0] sm:$0xff] }
  0x13   :  { %253 = vmatpush.msra.mxu3 %v124_v13  ;;  %234 = vmatpush.msra.mxu2 %v107_v12  ;;  %v121_v23 = vld [vmem:[#allocation5 + $0x1d0] sm:$0xff]  ;;  %v72_v24 = vld [vmem:[#allocation5 + $0x48] sm:$0xff]  ;;  %v71_v28 = vld [vmem:[#allocation5 + $0x40] sm:$0xff] }
  0x14   :  { %214 = vmatpush.msra.mxu1 %v91_v14  ;;  %195 = vmatpush.msra.mxu0 %v74_v16  ;;  %v104_v25 = vld [vmem:[#allocation5 + $0x148] sm:$0xff]  ;;  %v103_v29 = vld [vmem:[#allocation5 + $0x140] sm:$0xff]  ;;  %v70_v32 = vld [vmem:[#allocation5 + $0x38] sm:$0xff] }
  0x15   :  { %254 = vmatpush.msra.mxu3 %v123_v15  ;;  %235 = vmatpush.msra.mxu2 %v106_v17  ;;  %v88_v26 = vld [vmem:[#allocation5 + $0xc8] sm:$0xff]  ;;  %v87_v30 = vld [vmem:[#allocation5 + $0xc0] sm:$0xff]  ;;  %v102_v33 = vld [vmem:[#allocation5 + $0x138] sm:$0xff] }
  0x16   :  { %215 = vmatpush.msra.mxu1 %v90_v18  ;;  %196 = vmatpush.msra.mxu0 %v73_v20  ;;  %v120_v27 = vld [vmem:[#allocation5 + $0x1c8] sm:$0xff]  ;;  %v119_v31 = vld [vmem:[#allocation5 + $0x1c0] sm:$0xff]  ;;  %v86_v34 = vld [vmem:[#allocation5 + $0xb8] sm:$0xff] }
  0x17   :  { %255 = vmatpush.msra.mxu3 %v122_v19  ;;  %236 = vmatpush.msra.mxu2 %v105_v21  ;;  %v118_v35 = vld [vmem:[#allocation5 + $0x1b8] sm:$0xff]  ;;  %v69_v36 = vld [vmem:[#allocation5 + $0x30] sm:$0xff]  ;;  %v68_v40 = vld [vmem:[#allocation5 + $0x28] sm:$0xff] }
  0x18   :  { %216 = vmatpush.msra.mxu1 %v89_v22  ;;  %197 = vmatpush.msra.mxu0 %v72_v24  ;;  %v101_v37 = vld [vmem:[#allocation5 + $0x130] sm:$0xff]  ;;  %v100_v41 = vld [vmem:[#allocation5 + $0x128] sm:$0xff]  ;;  %v67_v44 = vld [vmem:[#allocation5 + $0x20] sm:$0xff] }
  0x19   :  { %256 = vmatpush.msra.mxu3 %v121_v23  ;;  %237 = vmatpush.msra.mxu2 %v104_v25  ;;  %v85_v38 = vld [vmem:[#allocation5 + $0xb0] sm:$0xff]  ;;  %v84_v42 = vld [vmem:[#allocation5 + $0xa8] sm:$0xff]  ;;  %v99_v45 = vld [vmem:[#allocation5 + $0x120] sm:$0xff] }
  0x1a   :  { %217 = vmatpush.msra.mxu1 %v88_v26  ;;  %198 = vmatpush.msra.mxu0 %v71_v28  ;;  %v117_v39 = vld [vmem:[#allocation5 + $0x1b0] sm:$0xff]  ;;  %v116_v43 = vld [vmem:[#allocation5 + $0x1a8] sm:$0xff]  ;;  %v83_v46 = vld [vmem:[#allocation5 + $0xa0] sm:$0xff] }
  0x1b   :  { %257 = vmatpush.msra.mxu3 %v120_v27  ;;  %238 = vmatpush.msra.mxu2 %v103_v29  ;;  %v115_v47 = vld [vmem:[#allocation5 + $0x1a0] sm:$0xff]  ;;  %v66_v48 = vld [vmem:[#allocation5 + $0x18] sm:$0xff]  ;;  %v65_v52 = vld [vmem:[#allocation5 + $0x10] sm:$0xff] }
  0x1c   :  { %218 = vmatpush.msra.mxu1 %v87_v30  ;;  %199 = vmatpush.msra.mxu0 %v70_v32  ;;  %v98_v49 = vld [vmem:[#allocation5 + $0x118] sm:$0xff]  ;;  %v97_v53 = vld [vmem:[#allocation5 + $0x110] sm:$0xff]  ;;  %v64_v56 = vld [vmem:[#allocation5 + $0x8] sm:$0xff] }
  0x1d   :  { %258 = vmatpush.msra.mxu3 %v119_v31  ;;  %239 = vmatpush.msra.mxu2 %v102_v33  ;;  %v82_v50 = vld [vmem:[#allocation5 + $0x98] sm:$0xff]  ;;  %v81_v54 = vld [vmem:[#allocation5 + $0x90] sm:$0xff]  ;;  %v96_v57 = vld [vmem:[#allocation5 + $0x108] sm:$0xff] }
  0x1e   :  { %219 = vmatpush.msra.mxu1 %v86_v34  ;;  %200 = vmatpush.msra.mxu0 %v69_v36  ;;  %v114_v51 = vld [vmem:[#allocation5 + $0x198] sm:$0xff]  ;;  %v113_v55 = vld [vmem:[#allocation5 + $0x190] sm:$0xff]  ;;  %v80_v58 = vld [vmem:[#allocation5 + $0x88] sm:$0xff] }
  0x1f   :  { %259 = vmatpush.msra.mxu3 %v118_v35  ;;  %240 = vmatpush.msra.mxu2 %v101_v37  ;;  %v112_v59 = vld [vmem:[#allocation5 + $0x188] sm:$0xff]  ;;  %v63_v60 = vld [vmem:[#allocation5] sm:$0xff]  ;;  %v142_v62 = vld [vmem:[#allocation5 + $0x278] sm:$0xff] }
  0x20   :  { %220 = vmatpush.msra.mxu1 %v85_v38  ;;  %201 = vmatpush.msra.mxu0 %v68_v40  ;;  %v95_v61 = vld [vmem:[#allocation5 + $0x100] sm:$0xff]  ;;  %v174_v63 = vld [vmem:[#allocation5 + $0x378] sm:$0xff]  ;;  %v141_v2 = vld [vmem:[#allocation5 + $0x270] sm:$0xff] }
  0x21   :  { %260 = vmatpush.msra.mxu3 %v117_v39  ;;  %241 = vmatpush.msra.mxu2 %v100_v41  ;;  %v79_v0 = vld [vmem:[#allocation5 + $0x80] sm:$0xff]  ;;  %v158_v3 = vld [vmem:[#allocation5 + $0x2f8] sm:$0xff]  ;;  %v173_v4 = vld [vmem:[#allocation5 + $0x370] sm:$0xff] }
  0x22   :  { %221 = vmatpush.msra.mxu1 %v84_v42  ;;  %202 = vmatpush.msra.mxu0 %v67_v44  ;;  %v111_v1 = vld [vmem:[#allocation5 + $0x180] sm:$0xff]  ;;  %v190_v5 = vld [vmem:[#allocation5 + $0x3f8] sm:$0xff]  ;;  %v140_v6 = vld [vmem:[#allocation5 + $0x268] sm:$0xff] }
  0x23   :  { %261 = vmatpush.msra.mxu3 %v116_v43  ;;  %242 = vmatpush.msra.mxu2 %v99_v45  ;;  %v157_v7 = vld [vmem:[#allocation5 + $0x2f0] sm:$0xff]  ;;  %v172_v8 = vld [vmem:[#allocation5 + $0x368] sm:$0xff]  ;;  %v139_v10 = vld [vmem:[#allocation5 + $0x260] sm:$0xff] }
  0x24   :  { %222 = vmatpush.msra.mxu1 %v83_v46  ;;  %203 = vmatpush.msra.mxu0 %v66_v48  ;;  %v189_v9 = vld [vmem:[#allocation5 + $0x3f0] sm:$0xff]  ;;  %v156_v11 = vld [vmem:[#allocation5 + $0x2e8] sm:$0xff]  ;;  %v171_v12 = vld [vmem:[#allocation5 + $0x360] sm:$0xff] }
  0x25   :  { %262 = vmatpush.msra.mxu3 %v115_v47  ;;  %243 = vmatpush.msra.mxu2 %v98_v49  ;;  %v188_v13 = vld [vmem:[#allocation5 + $0x3e8] sm:$0xff]  ;;  %v138_v14 = vld [vmem:[#allocation5 + $0x258] sm:$0xff]  ;;  %v155_v15 = vld [vmem:[#allocation5 + $0x2e0] sm:$0xff] }
  0x26   :  { %223 = vmatpush.msra.mxu1 %v82_v50  ;;  %204 = vmatpush.msra.mxu0 %v65_v52  ;;  %v170_v16 = vld [vmem:[#allocation5 + $0x358] sm:$0xff]  ;;  %v187_v17 = vld [vmem:[#allocation5 + $0x3e0] sm:$0xff]  ;;  %v137_v18 = vld [vmem:[#allocation5 + $0x250] sm:$0xff] }
  0x27   :  { %263 = vmatpush.msra.mxu3 %v114_v51  ;;  %244 = vmatpush.msra.mxu2 %v97_v53  ;;  %v154_v19 = vld [vmem:[#allocation5 + $0x2d8] sm:$0xff]  ;;  %v169_v20 = vld [vmem:[#allocation5 + $0x350] sm:$0xff]  ;;  %v136_v22 = vld [vmem:[#allocation5 + $0x248] sm:$0xff] }
  0x28   :  { %224 = vmatpush.msra.mxu1 %v81_v54  ;;  %205 = vmatpush.msra.mxu0 %v64_v56  ;;  %v186_v21 = vld [vmem:[#allocation5 + $0x3d8] sm:$0xff]  ;;  %v153_v23 = vld [vmem:[#allocation5 + $0x2d0] sm:$0xff]  ;;  %v168_v24 = vld [vmem:[#allocation5 + $0x348] sm:$0xff] }
  0x29   :  { %264 = vmatpush.msra.mxu3 %v113_v55  ;;  %245 = vmatpush.msra.mxu2 %v96_v57  ;;  %v185_v25 = vld [vmem:[#allocation5 + $0x3d0] sm:$0xff]  ;;  %v135_v26 = vld [vmem:[#allocation5 + $0x240] sm:$0xff]  ;;  %v152_v27 = vld [vmem:[#allocation5 + $0x2c8] sm:$0xff] }
  0x2a   :  { %225 = vmatpush.msra.mxu1 %v80_v58  ;;  %206 = vmatpush.msra.mxu0 %v63_v60  ;;  %v167_v28 = vld [vmem:[#allocation5 + $0x340] sm:$0xff]  ;;  %v184_v29 = vld [vmem:[#allocation5 + $0x3c8] sm:$0xff]  ;;  %v134_v30 = vld [vmem:[#allocation5 + $0x238] sm:$0xff] }
  0x2b   :  { %265 = vmatpush.msra.mxu3 %v112_v59  ;;  %246 = vmatpush.msra.mxu2 %v95_v61  ;;  %v151_v31 = vld [vmem:[#allocation5 + $0x2c0] sm:$0xff]  ;;  %v166_v32 = vld [vmem:[#allocation5 + $0x338] sm:$0xff]  ;;  %v133_v34 = vld [vmem:[#allocation5 + $0x230] sm:$0xff] }
  0x2c   :  { %271 = vmatpush.msrb.mxu0 %v142_v62  ;;  %226 = vmatpush.msra.mxu1 %v79_v0  ;;  %v183_v33 = vld [vmem:[#allocation5 + $0x3c0] sm:$0xff]  ;;  %v150_v35 = vld [vmem:[#allocation5 + $0x2b8] sm:$0xff]  ;;  %v165_v36 = vld [vmem:[#allocation5 + $0x330] sm:$0xff] }
  0x2d   :  { %311 = vmatpush.msrb.mxu2 %v174_v63  ;;  %266 = vmatpush.msra.mxu3 %v111_v1  ;;  %v182_v37 = vld [vmem:[#allocation5 + $0x3b8] sm:$0xff]  ;;  %v132_v38 = vld [vmem:[#allocation5 + $0x228] sm:$0xff]  ;;  %v149_v39 = vld [vmem:[#allocation5 + $0x2b0] sm:$0xff] }
  0x2e   :  { %272 = vmatpush.msrb.mxu0 %v141_v2  ;;  %291 = vmatpush.msrb.mxu1 %v158_v3  ;;  %v164_v40 = vld [vmem:[#allocation5 + $0x328] sm:$0xff]  ;;  %v181_v41 = vld [vmem:[#allocation5 + $0x3b0] sm:$0xff]  ;;  %v131_v43 = vld [vmem:[#allocation5 + $0x220] sm:$0xff] }
  0x2f   :  { %312 = vmatpush.msrb.mxu2 %v173_v4  ;;  %331 = vmatpush.msrb.mxu3 %v190_v5  ;;  %v57_v42 = vld [vmem:[#allocation2 + $0x10] sm:$0xff]  ;;  %v148_v44 = vld [vmem:[#allocation5 + $0x2a8] sm:$0xff]  ;;  %v163_v45 = vld [vmem:[#allocation5 + $0x320] sm:$0xff] }
  0x30   :  { %273 = vmatpush.msrb.mxu0 %v140_v6  ;;  %292 = vmatpush.msrb.mxu1 %v157_v7  ;;  %v180_v46 = vld [vmem:[#allocation5 + $0x3a8] sm:$0xff]  ;;  %v55_v47 = vld [vmem:[#allocation2] sm:$0xff]  ;;  %v58_v48 = vld [vmem:[#allocation2 + $0x18] sm:$0xff] }
  0x31   :  { %313 = vmatpush.msrb.mxu2 %v172_v8  ;;  %332 = vmatpush.msrb.mxu3 %v189_v9  ;;  %v130_v49 = vld [vmem:[#allocation5 + $0x218] sm:$0xff]  ;;  %v147_v50 = vld [vmem:[#allocation5 + $0x2a0] sm:$0xff]  ;;  %v56_v53 = vld [vmem:[#allocation2 + $0x8] sm:$0xff] }
  0x32   :  { %274 = vmatpush.msrb.mxu0 %v139_v10  ;;  %293 = vmatpush.msrb.mxu1 %v156_v11  ;;  %v162_v51 = vld [vmem:[#allocation5 + $0x318] sm:$0xff]  ;;  %v179_v52 = vld [vmem:[#allocation5 + $0x3a0] sm:$0xff]  ;;  %v129_v54 = vld [vmem:[#allocation5 + $0x210] sm:$0xff] }
  0x33   :  { %314 = vmatpush.msrb.mxu2 %v171_v12  ;;  %333 = vmatpush.msrb.mxu3 %v188_v13  ;;  %v146_v55 = vld [vmem:[#allocation5 + $0x298] sm:$0xff]  ;;  %v161_v56 = vld [vmem:[#allocation5 + $0x310] sm:$0xff]  ;;  %v128_v58 = vld [vmem:[#allocation5 + $0x208] sm:$0xff] }
  0x34   :  { %275 = vmatpush.msrb.mxu0 %v138_v14  ;;  %294 = vmatpush.msrb.mxu1 %v155_v15  ;;  %v178_v57 = vld [vmem:[#allocation5 + $0x398] sm:$0xff]  ;;  %v145_v59 = vld [vmem:[#allocation5 + $0x290] sm:$0xff]  ;;  %v160_v60 = vld [vmem:[#allocation5 + $0x308] sm:$0xff] }
  0x35   :  { %315 = vmatpush.msrb.mxu2 %v170_v16  ;;  %334 = vmatpush.msrb.mxu3 %v187_v17  ;;  %v177_v61 = vld [vmem:[#allocation5 + $0x390] sm:$0xff]  ;;  %v127_v62 = vld [vmem:[#allocation5 + $0x200] sm:$0xff]  ;;  %v144_v63 = vld [vmem:[#allocation5 + $0x288] sm:$0xff] }
  0x36   :  { %276 = vmatpush.msrb.mxu0 %v137_v18  ;;  %295 = vmatpush.msrb.mxu1 %v154_v19  ;;  %v159_v0 = vld [vmem:[#allocation5 + $0x300] sm:$0xff]  ;;  %v176_v1 = vld [vmem:[#allocation5 + $0x388] sm:$0xff]  ;;  %v61_v3 = vld [vmem:[#allocation2 + $0x30] sm:$0xff] }
  0x37   :  { %316 = vmatpush.msrb.mxu2 %v169_v20  ;;  %335 = vmatpush.msrb.mxu3 %v186_v21  ;;  %v59_v2 = vld [vmem:[#allocation2 + $0x20] sm:$0xff]  ;;  %v60_v6 = vld [vmem:[#allocation2 + $0x28] sm:$0xff]  ;;  %v62_v7 = vld [vmem:[#allocation2 + $0x38] sm:$0xff] }
  0x38   :  { %277 = vmatpush.msrb.mxu0 %v136_v22  ;;  %296 = vmatpush.msrb.mxu1 %v153_v23  ;;  %v143_v4 = vld [vmem:[#allocation5 + $0x280] sm:$0xff] }
  0x39   :  { %317 = vmatpush.msrb.mxu2 %v168_v24  ;;  %336 = vmatpush.msrb.mxu3 %v185_v25  ;;  %v175_v5 = vld [vmem:[#allocation5 + $0x380] sm:$0xff] }
  0x3a   :  { %278 = vmatpush.msrb.mxu0 %v135_v26  ;;  %297 = vmatpush.msrb.mxu1 %v152_v27  ;;  %v376_v21 = vld [vmem:[%s494_s2] ss:$0 sm:$0xff] }
  0x3b   :  { %318 = vmatpush.msrb.mxu2 %v167_v28  ;;  %337 = vmatpush.msrb.mxu3 %v184_v29 }
  0x3c   :  { %279 = vmatpush.msrb.mxu0 %v134_v30  ;;  %298 = vmatpush.msrb.mxu1 %v151_v31 }
  0x3d   :  { %319 = vmatpush.msrb.mxu2 %v166_v32  ;;  %338 = vmatpush.msrb.mxu3 %v183_v33 }
  0x3e   :  { %280 = vmatpush.msrb.mxu0 %v133_v34  ;;  %299 = vmatpush.msrb.mxu1 %v150_v35 }
  0x3f   :  { %320 = vmatpush.msrb.mxu2 %v165_v36  ;;  %339 = vmatpush.msrb.mxu3 %v182_v37 }
  0x40   :  { %281 = vmatpush.msrb.mxu0 %v132_v38  ;;  %300 = vmatpush.msrb.mxu1 %v149_v39 }
  0x41   :  { %321 = vmatpush.msrb.mxu2 %v164_v40  ;;  %340 = vmatpush.msrb.mxu3 %v181_v41 }
  0x42   :  { %247 = vmatmul.f32.vlgmr.msra.gmra.mxu2 %v57_v42  ;;  %282 = vmatpush.msrb.mxu0 %v131_v43 }
  0x43   :  { %301 = vmatpush.msrb.mxu1 %v148_v44  ;;  %322 = vmatpush.msrb.mxu2 %v163_v45 }
  0x44   :  { %341 = vmatpush.msrb.mxu3 %v180_v46  ;;  %207 = vmatmul.f32.vlgmr.msra.gmra.mxu0 %v55_v47 }
  0x45   :  { %267 = vmatmul.f32.vlgmr.msra.gmra.mxu3 %v58_v48  ;;  %283 = vmatpush.msrb.mxu0 %v130_v49 }
  0x46   :  { %302 = vmatpush.msrb.mxu1 %v147_v50  ;;  %323 = vmatpush.msrb.mxu2 %v162_v51 }
  0x47   :  { %342 = vmatpush.msrb.mxu3 %v179_v52  ;;  %227 = vmatmul.f32.vlgmr.msra.gmra.mxu1 %v56_v53 }
  0x48   :  { %284 = vmatpush.msrb.mxu0 %v129_v54  ;;  %303 = vmatpush.msrb.mxu1 %v146_v55 }
  0x49   :  { %324 = vmatpush.msrb.mxu2 %v161_v56  ;;  %343 = vmatpush.msrb.mxu3 %v178_v57 }
  0x4a   :  { %285 = vmatpush.msrb.mxu0 %v128_v58  ;;  %304 = vmatpush.msrb.mxu1 %v145_v59 }
  0x4b   :  { %325 = vmatpush.msrb.mxu2 %v160_v60  ;;  %344 = vmatpush.msrb.mxu3 %v177_v61 }
  0x4c   :  { %286 = vmatpush.msrb.mxu0 %v127_v62  ;;  %305 = vmatpush.msrb.mxu1 %v144_v63 }
  0x4d   :  { %326 = vmatpush.msrb.mxu2 %v159_v0  ;;  %345 = vmatpush.msrb.mxu3 %v176_v1 }
  0x4e   :  { %287 = vmatmul.f32.vlgmr.msrb.gmra.mxu0 %v59_v2  ;;  %327 = vmatmul.f32.vlgmr.msrb.gmra.mxu2 %v61_v3 }
  0x4f   :  { %306 = vmatpush.msrb.mxu1 %v143_v4  ;;  %346 = vmatpush.msrb.mxu3 %v175_v5 }
  0x50   :  { %307 = vmatmul.f32.vlgmr.msrb.gmra.mxu1 %v60_v6  ;;  %347 = vmatmul.f32.vlgmr.msrb.gmra.mxu3 %v62_v7 }
  0xc1   :  { %v208_v8 = vpop.f32.mrf.mxu0 }
  0xc4   :  { %v228_v9 = vpop.f32.mrf.mxu1 }
  0xc5   :  { %v229_v10 = vadd.f32 %v228_v9, %v208_v8  ;;  %v248_v11 = vpop.f32.mrf.mxu2 }
  0xc7   :  { %v249_v12 = vadd.f32 %v248_v11, %v229_v10 }
  0xc8   :  { %v268_v13 = vpop.f32.mrf.mxu3 }
  0xc9   :  { %v269_v14 = vadd.f32 %v268_v13, %v249_v12 }
  0xcb   :  { %v288_v15 = vpop.f32.mrf.mxu0 }
  0xcc   :  { %v289_v16 = vadd.f32 %v288_v15, %v269_v14 }
  0xcd   :  { %v308_v17 = vpop.f32.mrf.mxu1 }
  0xce   :  { %v309_v18 = vadd.f32 %v308_v17, %v289_v16 }
  0xd1   :  { %v328_v19 = vpop.f32.mrf.mxu2 }
  0xd2   :  { %v329_v20 = vadd.f32 %v328_v19, %v309_v18 }
  0xd3   :  { %v348_v22 = vpop.f32.mrf.mxu3 }
  0xd4   :  { %v349_v23 = vadd.f32 %v348_v22, %v329_v20 }
  0xd6   :  { %v351_v24 = vadd.f32 %v376_v21, %v349_v23 }
  0xd8   :  { %352 = vst [vmem:[#allocation7] sm:$0xff] %v351_v24 }
  0xd9   :  { %363 = dma.vmem_to_hbm [thread:$0]  %s359_s25, 128, %s361_s28, [#allocation4]  }
  0xda   :  { %453 = dma.done.wait [#allocation4], 128  }
  0xdb   :  { %454 = vsyncadd [#allocation4], 4294967168 }
  0xdc   :  { %368 = vsyncpa [#allocation3], 1 }
  0xdd   :  { %369 = vsyncpa [#allocation6], 1 }
  0xde   :  { %370 = vsyncpa [#allocation4], 1 }

</bundles_post_ra>
